<compile_context>
chip_gen: v7x
topology: tpu7x:2x2x1
jax: 0.10.0
libtpu: 0.0.40
codegen_flags: <defaults>
</compile_context>

<pallas_src>
import jax
import jax.numpy as jnp
from jax import lax
from jax.experimental import pallas as pl
from jax.experimental.pallas import tpu as pltpu


def _round_up(x, m):
    return (x + m - 1) // m * m


def _make_linear_kernel(compute_dtype):
    def kernel(x_ref, w_ref, b_ref, o_ref, acc_ref):
        # x_ref: (tm, tk)   activations tile
        # w_ref: (tn, tk)   weight tile, natural (labels, features) layout
        # b_ref: (1, tn)    bias tile
        # o_ref: (tm, tn)   output tile (resident across the K axis)
        # acc_ref: (tm, tn) f32 accumulator scratch
        k = pl.program_id(2)

        @pl.when(k == 0)
        def _():
            acc_ref[...] = jnp.zeros_like(acc_ref)

        # Contract last dim of x with last dim of w: x[m,k] * w[n,k] -> (m,n).
        acc_ref[...] += lax.dot_general(
            x_ref[...].astype(compute_dtype),
            w_ref[...],
            dimension_numbers=(((1,), (1,)), ((), ())),
            preferred_element_type=jnp.float32,
        )

        @pl.when(k == pl.num_programs(2) - 1)
        def _():
            o_ref[...] = (acc_ref[...] + b_ref[...]).astype(o_ref.dtype)

    return kernel


def linear_classifier_forward(x_nchw, weight, bias, dim,
                              *, compute_dtype=jnp.bfloat16):
    """Forward of LinearClassifier ('main_part' branch).

    x_nchw : (B, C, H, W) float32  frozen features, NCHW like PyTorch
    weight : (num_labels, dim) float32   nn.Linear weight
    bias   : (num_labels,)     float32   nn.Linear bias
    dim    : number of leading flattened features kept (x = x[:, :dim])
    """
    B = x_nchw.shape[0]
    num_labels, w_dim = weight.shape
    assert w_dim == dim, "weight feature dim must match `dim`"

    x_flat = x_nchw.reshape(B, -1)            # free (metadata) reshape
    f_total = x_flat.shape[1]
    assert f_total >= dim

    # ---- padded problem sizes & tile sizes ---------------------------------
    k_pad = _round_up(dim, 128)
    tk = 512 if k_pad % 512 == 0 else (256 if k_pad % 256 == 0 else 128)

    n_pad = _round_up(num_labels, 128)        # lane-dense output
    tn = 256 if n_pad % 256 == 0 else 128     # 256-multiples feed v6e/v7x MXU

    tm = 256 if B >= 256 else _round_up(B, 8)
    m_pad = _round_up(B, tm)

    # ---- prepare operands (avoid extra HBM passes when shapes line up) -----
    needs_x_pad = (m_pad != B) or (f_total < k_pad)
    if needs_x_pad:
        x_use = x_flat[:, : min(f_total, k_pad)]
        x_in = jnp.pad(
            x_use, ((0, m_pad - B), (0, k_pad - x_use.shape[1])))
    else:
        # Pass the full flattened activations; the K grid never reads columns
        # >= k_pad, and columns in [dim, k_pad) meet zero weight rows below.
        x_in = x_flat

    w_pad = jnp.zeros((n_pad, k_pad), dtype=compute_dtype)
    w_pad = w_pad.at[:num_labels, :dim].set(weight.astype(compute_dtype))

    b_pad = jnp.zeros((1, n_pad), dtype=jnp.float32)
    b_pad = b_pad.at[0, :num_labels].set(bias.astype(jnp.float32))

    grid = (m_pad // tm, n_pad // tn, k_pad // tk)

    bytes_accessed = (m_pad * k_pad * x_in.dtype.itemsize      # x tiles read
                      + n_pad * k_pad * w_pad.dtype.itemsize   # weight
                      + n_pad * 4                              # bias
                      + m_pad * n_pad * 4)                     # output

    out_padded = pl.pallas_call(
        _make_linear_kernel(compute_dtype),
        out_shape=jax.ShapeDtypeStruct((m_pad, n_pad), jnp.float32),
        grid_spec=pltpu.PrefetchScalarGridSpec(
            num_scalar_prefetch=0,
            grid=grid,
            in_specs=[
                pl.BlockSpec((tm, tk), lambda i, j, k: (i, k)),   # x
                pl.BlockSpec((tn, tk), lambda i, j, k: (j, k)),   # weight
                pl.BlockSpec((1, tn), lambda i, j, k: (0, j)),    # bias
            ],
            out_specs=pl.BlockSpec((tm, tn), lambda i, j, k: (i, j)),
            scratch_shapes=[pltpu.VMEM((tm, tn), jnp.float32)],
        ),
        compiler_params=pltpu.CompilerParams(
            dimension_semantics=("parallel", "parallel", "arbitrary")),
        cost_estimate=pl.CostEstimate(
            flops=2 * m_pad * n_pad * k_pad,
            transcendentals=0,
            bytes_accessed=bytes_accessed),
    )(x_in, w_pad, b_pad)

    # Strip batch / label padding.
    return out_padded[:B, :num_labels]


if __name__ == "__main__":
    # Small shapes consistent with the module's forward:
    # frozen backbone features (B, C, H, W); flattened dim = C*H*W = 64,
    # classifier keeps dim=32 of them ('main_part'), num_labels=16.
    # (Note: at shapes this tiny a plain XLA matmul would be faster; the
    #  tiling above is sized for realistic eval_linear shapes.)
    B, C, H, W = 2, 4, 4, 4
    DIM = 32
    NUM_LABELS = 16

    key = jax.random.PRNGKey(0)
    kx, kw = jax.random.split(key)

    x = jax.random.normal(kx, (B, C, H, W), dtype=jnp.float32)

    # nn.Linear(dim, num_labels): weight ~ N(0, 0.01), bias = 0 (as in __init__)
    weight = 0.01 * jax.random.normal(kw, (NUM_LABELS, DIM), dtype=jnp.float32)
    bias = jnp.zeros((NUM_LABELS,), dtype=jnp.float32)

    out = linear_classifier_forward(x, weight, bias, DIM)
    out = jax.block_until_ready(out)

    # reference check in plain f32 JAX (kernel uses bf16 MXU inputs with f32
    # accumulation, so allow a small tolerance)
    ref = x.reshape(B, -1)[:, :DIM] @ weight.T + bias
    assert out.shape == (B, NUM_LABELS)
    assert jnp.allclose(out, ref, atol=5e-3, rtol=5e-2), float(
        jnp.max(jnp.abs(out - ref)))

    print("KERNEL_OK")
</pallas_src>

<mosaic_0001>
module attributes {stable_mosaic.version = 11 : i64} {
  func.func @kernel(%arg0: i32, %arg1: i32, %arg2: i32, %arg3: memref<8x128xf32, #tpu.memory_space<vmem>>, %arg4: memref<128x128xbf16, #tpu.memory_space<vmem>>, %arg5: memref<1x128xf32, #tpu.memory_space<vmem>>, %arg6: memref<8x128xf32, #tpu.memory_space<vmem>>, %arg7: memref<8x128xf32, #tpu.memory_space<vmem>>) attributes {dimension_semantics = [#tpu.dimension_semantics<parallel>, #tpu.dimension_semantics<parallel>, #tpu.dimension_semantics<arbitrary>], iteration_bounds = array<i64: 1, 1, 1>, scalar_prefetch = 0 : i64, scratch_operands = 1 : i64, tpu.core_type = #tpu.core_type<tc>, window_params = [{transform_indices = @transform_0, window_bounds = array<i64: 8, 128>}, {transform_indices = @transform_1, window_bounds = array<i64: 128, 128>}, {transform_indices = @transform_2, window_bounds = array<i64: 1, 128>}, {transform_indices = @transform_3, window_bounds = array<i64: 8, 128>}]} {
    %c0_i32 = arith.constant 0 : i32
    %0 = arith.cmpi eq, %arg2, %c0_i32 : i32
    %1 = arith.extui %0 : i1 to i32
    %c0_i32_0 = arith.constant 0 : i32
    %2 = arith.cmpi ne, %1, %c0_i32_0 : i32
    scf.if %2 {
      %cst_10 = arith.constant 0.000000e+00 : f32
      %13 = vector.broadcast %cst_10 : f32 to vector<8x128xf32>
      %c0_11 = arith.constant 0 : index
      %c0_12 = arith.constant 0 : index
      %14 = vector.load %arg7[%c0_11, %c0_12] : memref<8x128xf32, #tpu.memory_space<vmem>>, vector<8x128xf32>
      tpu.vector_store %arg7[%c0_11, %c0_12], %13 {strides = array<i32>} : memref<8x128xf32, #tpu.memory_space<vmem>>, vector<8x128xf32>,
    } else {
    }
    %c0 = arith.constant 0 : index
    %c0_1 = arith.constant 0 : index
    %3 = vector.load %arg7[%c0, %c0_1] : memref<8x128xf32, #tpu.memory_space<vmem>>, vector<8x128xf32>
    %c0_2 = arith.constant 0 : index
    %c0_3 = arith.constant 0 : index
    %4 = vector.load %arg3[%c0_2, %c0_3] : memref<8x128xf32, #tpu.memory_space<vmem>>, vector<8x128xf32>
    %5 = arith.truncf %4 : vector<8x128xf32> to vector<8x128xbf16>
    %c0_4 = arith.constant 0 : index
    %c0_5 = arith.constant 0 : index
    %6 = vector.load %arg4[%c0_4, %c0_5] : memref<128x128xbf16, #tpu.memory_space<vmem>>, vector<128x128xbf16>
    %cst = arith.constant dense<0.000000e+00> : vector<8x128xf32>
    %7 = tpu.matmul %5, %6, %cst {dimension_numbers = #tpu.dot_dimension_numbers<[1], [1], [0], [0], [0, 0, 1, 0], [], []>} : vector<8x128xbf16>, vector<128x128xbf16>, vector<8x128xf32> -> vector<8x128xf32>
    %8 = arith.addf %3, %7 : vector<8x128xf32>
    %c0_6 = arith.constant 0 : index
    %c0_7 = arith.constant 0 : index
    %9 = vector.load %arg7[%c0_6, %c0_7] : memref<8x128xf32, #tpu.memory_space<vmem>>, vector<8x128xf32>
    tpu.vector_store %arg7[%c0_6, %c0_7], %8 {strides = array<i32>} : memref<8x128xf32, #tpu.memory_space<vmem>>, vector<8x128xf32>,
    %c0_i32_8 = arith.constant 0 : i32
    %10 = arith.cmpi eq, %arg2, %c0_i32_8 : i32
    %11 = arith.extui %10 : i1 to i32
    %c0_i32_9 = arith.constant 0 : i32
    %12 = arith.cmpi ne, %11, %c0_i32_9 : i32
    scf.if %12 {
      %c0_10 = arith.constant 0 : index
      %c0_11 = arith.constant 0 : index
      %13 = vector.load %arg7[%c0_10, %c0_11] : memref<8x128xf32, #tpu.memory_space<vmem>>, vector<8x128xf32>
      %c0_12 = arith.constant 0 : index
      %c0_13 = arith.constant 0 : index
      %14 = vector.load %arg5[%c0_12, %c0_13] : memref<1x128xf32, #tpu.memory_space<vmem>>, vector<1x128xf32>
      %15 = vector.broadcast %14 : vector<1x128xf32> to vector<8x128xf32>
      %16 = arith.addf %13, %15 : vector<8x128xf32>
      %c0_14 = arith.constant 0 : index
      %c0_15 = arith.constant 0 : index
      %17 = vector.load %arg6[%c0_14, %c0_15] : memref<8x128xf32, #tpu.memory_space<vmem>>, vector<8x128xf32>
      tpu.vector_store %arg6[%c0_14, %c0_15], %16 {strides = array<i32>} : memref<8x128xf32, #tpu.memory_space<vmem>>, vector<8x128xf32>,
    } else {
    }
    return
  }
  func.func @transform_0(%arg0: i32, %arg1: i32, %arg2: i32) -> (i32, i32) {
    %c0_i32 = arith.constant 0 : i32
    return %arg0, %arg2 : i32, i32
  }
  func.func @transform_1(%arg0: i32, %arg1: i32, %arg2: i32) -> (i32, i32) {
    %c0_i32 = arith.constant 0 : i32
    return %arg1, %arg2 : i32, i32
  }
  func.func @transform_2(%arg0: i32, %arg1: i32, %arg2: i32) -> (i32, i32) {
    %c0_i32 = arith.constant 0 : i32
    %c0_i32_0 = arith.constant 0 : i32
    return %c0_i32, %arg1 : i32, i32
  }
  func.func @transform_3(%arg0: i32, %arg1: i32, %arg2: i32) -> (i32, i32) {
    %c0_i32 = arith.constant 0 : i32
    return %arg0, %arg1 : i32, i32
  }
}

</mosaic_0001>

<bundles_post_ra>
// kernel: tpu_custom_call.1
= control target key start
LH: loop header
LB: loop body
LE: loop exit
PB: predicated region body
PF: predicated region fallthrough
CT: control target
= control target key end

     0   :  { %8 = vsyncpa [#allocation4], 0  ;;  %s383_s0 = inlined_call_operand.hbm [shape: f32[8,128], index: 0, kind: input, shape index: {}]   ;;  %s384_s1 = inlined_call_operand.hbm [shape: bf16[128,128], index: 1, kind: input, shape index: {}]   ;;  %s385_s2 = inlined_call_operand.vmem [shape: f32[1,128], index: 2, kind: input, shape index: {}]   ;;  %s386_s3 = inlined_call_operand.hbm [shape: f32[8,128], index: 3, kind: output, shape index: {}]  }
   0x1   :  { %9 = vsyncpa [#allocation7], 0 }
   0x2   :  { %10 = vsyncpa [#allocation5], 0  ;;  %s310_s12 = smov [#allocation3]   ;;  %s311_s14 = smov [#allocation6]  }
   0x3   :  { %s17_s13 = sshll.u32 %s310_s12, 4  ;;  %s26_s15 = sshll.u32 %s311_s14, 4  ;;  %s18_s13 = int_to_ptr.vmem [resolvable:$true] %s17_s13  ;;  %s337_s15 = int_to_ptr.vmem [resolvable:$true] %s26_s15 }
   0x4   :  { %s238_s18 = scalar_lea.hbm %s383_s0, 128 }
   0x5   :  { %p239_p0 = scmp.ne.s32.totalorder %s383_s0, %s238_s18  ;;  %p242_p1 = scmp.lt.u32.totalorder %s238_s18, %s383_s0 }
   0x7   :  { %p244_p2 = pnand %p242_p1, %p239_p0 }
   0x9   :  { %247 = shalt.err (!%p244_p2)
}
   0xa   :  { %s248_s23 = scalar_lea.vmem %s18_s13, 128  ;;  %p253_p4 = scmp.lt.s32.totalorder %s18_s13, %s18_s13 }
   0xb   :  { %p249_p3 = scmp.ne.s32.totalorder %s18_s13, %s248_s23  ;;  %p254_p5 = scmp.lt.s32.totalorder %s248_s23, %s248_s23 }
   0xd   :  { %p255_p6 = por %p254_p5, %p253_p4 }
   0xf   :  { %p256_p7 = pnand %p255_p6, %p249_p3 }
  0x11   :  { %259 = shalt.err (!%p256_p7)
}
  0x12   :  { %20 = dma.hbm_to_vmem [thread:$0]  %s383_s0, 128, %s18_s13, [#allocation4]  }
  0x13   :  { %s260_s28 = scalar_lea.hbm %s384_s1, 1024 }
  0x14   :  { %p261_p8 = scmp.ne.s32.totalorder %s384_s1, %s260_s28  ;;  %p264_p9 = scmp.lt.u32.totalorder %s260_s28, %s384_s1 }
  0x16   :  { %p266_p10 = pnand %p264_p9, %p261_p8 }
  0x18   :  { %269 = shalt.err (!%p266_p10)
}
  0x19   :  { %s270_s6 = scalar_lea.vmem %s337_s15, 1024  ;;  %p275_p12 = scmp.lt.s32.totalorder %s337_s15, %s337_s15 }
  0x1a   :  { %p271_p11 = scmp.ne.s32.totalorder %s337_s15, %s270_s6  ;;  %p276_p13 = scmp.lt.s32.totalorder %s270_s6, %s270_s6 }
  0x1c   :  { %p277_p0 = por %p276_p13, %p275_p12 }
  0x1e   :  { %p278_p1 = pnand %p277_p0, %p271_p11 }
  0x20   :  { %281 = shalt.err (!%p278_p1)
}
  0x21   :  { %s312_s0 = smov 64   ;;  %s313_s7 = smov 4  }
  0x22   :  { %32 = dma.hbm_to_vmem [thread:$0]  %s384_s1, 1024, %s337_s15, [#allocation7], %s312_s0, %s312_s0, %s313_s7  }
  0x23   :  { %304 = dma.done.wait [#allocation4], 128  }
  0x24   :  { %305 = vsyncadd [#allocation4], 4294967168 }
  0x25   :  { %306 = dma.done.wait [#allocation7], 1024  }
  0x26   :  { %307 = vsyncadd [#allocation7], 4294966272  ;;  %v314_v0 = vmov 0.0   ;;  %vm315_vm0 = vmmov 0   ;;  %v230_v1 = vld [vmem:[#allocation6] sm:$0xff]   ;;  %v231_v2 = vld [vmem:[#allocation6 + $0x8] sm:$0xff]  }
  0x27   :  { %203 = vmatprep.subr.bf16.mxu0 %v314_v0  ;;  %219 = vmatprep.mubr.msk.bf16.mxu0 %vm315_vm0, %v314_v0  ;;  %v232_v3 = vld [vmem:[#allocation6 + $0x10] sm:$0xff]   ;;  %v233_v4 = vld [vmem:[#allocation6 + $0x18] sm:$0xff]   ;;  %v234_v5 = vld [vmem:[#allocation6 + $0x20] sm:$0xff]   ;;  %s316_s11 = smov [#allocation8]  }
  0x28   :  { %204 = vmatpush3.bf16.xpose.msra.mxu0 %v230_v1  ;;  %v235_v6 = vld [vmem:[#allocation6 + $0x28] sm:$0xff]   ;;  %v236_v7 = vld [vmem:[#allocation6 + $0x30] sm:$0xff]   ;;  %v237_v8 = vld [vmem:[#allocation6 + $0x38] sm:$0xff]   ;;  %s175_s12 = sshll.u32 %s316_s11, 4  ;;  %s176_s12 = int_to_ptr.vmem [resolvable:$true] %s175_s12 }
  0x29   :  { %205 = vmatprep.subr.bf16.mxu0 %v314_v0  ;;  %v48_v9 = vld [vmem:[#allocation3] sm:$0xff]  ;;  %s282_s13 = scalar_lea.vmem %s176_s12, 128  ;;  %p287_p3 = scmp.lt.s32.totalorder %s176_s12, %s176_s12 }
  0x2a   :  { %v49_v10 = vpack.c.bf16 %v48_v9, %v48_v9  ;;  %v193_v11 = vld [vmem:[%s385_s2] ss:$0 sm:$0xff]  ;;  %p283_p2 = scmp.ne.s32.totalorder %s176_s12, %s282_s13  ;;  %p288_p4 = scmp.lt.s32.totalorder %s282_s13, %s282_s13 }
  0x2c   :  { %p289_p5 = por %p288_p4, %p287_p3 }
  0x2e   :  { %p290_p6 = pnand %p289_p5, %p283_p2 }
  0x30   :  { %206 = vmatpush3.bf16.xpose.msra.mxu0 %v231_v2 }
  0x31   :  { %207 = vmatprep.subr.bf16.mxu0 %v314_v0 }
  0x38   :  { %208 = vmatpush3.bf16.xpose.msra.mxu0 %v232_v3 }
  0x39   :  { %209 = vmatprep.subr.bf16.mxu0 %v314_v0 }
  0x40   :  { %210 = vmatpush3.bf16.xpose.msra.mxu0 %v233_v4 }
  0x41   :  { %211 = vmatprep.subr.bf16.mxu0 %v314_v0 }
  0x48   :  { %212 = vmatpush3.bf16.xpose.msra.mxu0 %v234_v5 }
  0x49   :  { %213 = vmatprep.subr.bf16.mxu0 %v314_v0 }
  0x50   :  { %214 = vmatpush3.bf16.xpose.msra.mxu0 %v235_v6 }
  0x51   :  { %215 = vmatprep.subr.bf16.mxu0 %v314_v0 }
  0x58   :  { %216 = vmatpush3.bf16.xpose.msra.mxu0 %v236_v7 }
  0x59   :  { %217 = vmatprep.subr.bf16.mxu0 %v314_v0 }
  0x60   :  { %218 = vmatpush3.bf16.xpose.msra.mxu0 %v237_v8 }
  0x67   :  { %220 = vmatmul.mubr.bf16.vlgmr.msra.gmra.mrb[0].mxu0 %v49_v10 }
 0x13a   :  { %v148_v12 = vpop.f32.mrb[0].mxu0 }
 0x13b   :  { %v167_v13 = vadd.f32 %v193_v11, %v148_v12  ;;  %v221_v14 = vpop.f32.mrb[1].mxu0 }
 0x13c   :  { %v151_v15 = vpop.f32.mrb[2].mxu0 }
 0x13d   :  { %168 = vst [vmem:[#allocation8] sm:$0xff] %v167_v13  ;;  %v222_v16 = vpop.f32.mrb[3].mxu0 }
 0x13e   :  { %293 = shalt.err (!%p290_p6)
}
 0x13f   :  { %s294_s2 = scalar_lea.hbm %s386_s3, 128 }
 0x140   :  { %p295_p7 = scmp.ne.s32.totalorder %s386_s3, %s294_s2  ;;  %p298_p8 = scmp.lt.u32.totalorder %s294_s2, %s386_s3 }
 0x142   :  { %p300_p9 = pnand %p298_p8, %p295_p7 }
 0x144   :  { %303 = shalt.err (!%p300_p9)
}
 0x145   :  { %178 = dma.vmem_to_hbm [thread:$0]  %s176_s12, 128, %s386_s3, [#allocation5]  }
 0x146   :  { %308 = dma.done.wait [#allocation5], 128  }
 0x147   :  { %309 = vsyncadd [#allocation5], 4294967168 }
 0x148   :  { %182 = vsyncpa [#allocation4], 1 }
 0x149   :  { %183 = vsyncpa [#allocation7], 1 }
 0x14a   :  { %184 = vsyncpa [#allocation5], 1 }

</bundles_post_ra>
